<compile_context>
chip_gen: v7x
topology: tpu7x:2x2x1
jax: 0.10.0
libtpu: 0.0.40
codegen_flags: <defaults>
</compile_context>

<pallas_src>
import functools
import math
from typing import NamedTuple, Tuple

import jax
import jax.numpy as jnp
from jax.experimental import pallas as pl
from jax.experimental.pallas import tpu as pltpu


def _round_up(x, m):
    return ((x + m - 1) // m) * m


class PackedActorParams(NamedTuple):
    """Pre-padded / pre-cast parameters (built once, reused every call)."""
    weights: Tuple[jax.Array, ...]   # each (n_agents, in_p, out_p), compute_dtype
    biases: Tuple[jax.Array, ...]    # each (n_agents, 1, out_p), float32
    sizes: Tuple[int, ...]           # true feature sizes at layer boundaries
    sizes_p: Tuple[int, ...]         # lane-padded (multiple of 128) sizes
    action_size: int
    compute_dtype: object            # numpy dtype fed to the MXU


def pack_multi_actor_params(agent_params, *, compute_dtype=jnp.bfloat16):
    """Pad + cast parameters ONCE (hoisted off the per-call critical path).

    agent_params: list (len n_agents) of per-agent param lists; each param
    list is [(W, b), ...] with W shaped (in, out) (transposed vs. PyTorch)
    and b shaped (1, out) or (out,).  All agents must share layer sizes.
    """
    compute_dtype = jnp.dtype(compute_dtype)
    ref = agent_params[0]
    num_layers = len(ref)
    sizes = [ref[0][0].shape[0]] + [w.shape[1] for w, _ in ref]
    sizes_p = [_round_up(s, 128) for s in sizes]

    weights, biases = [], []
    for i in range(num_layers):
        w_stack = jnp.stack([jnp.asarray(p[i][0], jnp.float32)
                             for p in agent_params])                 # (A,in,out)
        b_stack = jnp.stack([jnp.asarray(p[i][1], jnp.float32).reshape(1, -1)
                             for p in agent_params])                 # (A,1,out)
        # Zero padding keeps the math exact on the valid slice.
        w_p = jnp.pad(w_stack, ((0, 0),
                                (0, sizes_p[i] - sizes[i]),
                                (0, sizes_p[i + 1] - sizes[i + 1]))
                      ).astype(compute_dtype)
        b_p = jnp.pad(b_stack, ((0, 0), (0, 0),
                                (0, sizes_p[i + 1] - sizes[i + 1])))
        weights.append(w_p)
        biases.append(b_p)
    return PackedActorParams(tuple(weights), tuple(biases), tuple(sizes),
                             tuple(sizes_p), sizes[-1], compute_dtype)


def pack_actor_params(params, *, compute_dtype=jnp.bfloat16):
    """Single-agent convenience wrapper around pack_multi_actor_params."""
    return pack_multi_actor_params([params], compute_dtype=compute_dtype)


def _actor_kernel(num_layers, compute_dtype, f32_epilogue, x_ref, *refs):
    """Full padded MLP forward for one (agent, batch-tile).

    refs layout: [(w_i, b_i) * num_layers, out_ref].  Weights arrive in
    compute_dtype (bf16 or f32), biases f32.  Matmuls accumulate in f32.
    ReLU runs in bf16 (v6e/v7x) unless f32_epilogue is set (v5e path).
    """
    out_ref = refs[-1]
    prefs = refs[:-1]

    h = x_ref[...]                                     # (tile, in_p), compute_dtype
    for i in range(num_layers):
        w = prefs[2 * i][...]                          # (in_p, out_p)
        b = prefs[2 * i + 1][...]                      # (1, out_p), f32
        y = jnp.dot(h, w, preferred_element_type=jnp.float32) + b
        if i < num_layers - 1:
            if f32_epilogue:
                # v5e: no bf16 VPU -> ReLU in f32, cast once for the next MXU op.
                h = jnp.maximum(y, 0.0).astype(compute_dtype)
            else:
                # v6e/v7x: ReLU directly on compute_dtype activations.
                h = jnp.maximum(y.astype(compute_dtype),
                                jnp.zeros((), compute_dtype))
        else:
            h = jnp.tanh(y)                            # EUP, f32, final layer only
    out_ref[...] = h.astype(out_ref.dtype)             # lane-dense 128-wide store


def actor_forward(state, packed: PackedActorParams, *, tile_b=None,
                  f32_epilogue=None, out_dtype=None, vmem_limit_bytes=None,
                  slice_output=True):
    """Actor forward pass as a single Pallas kernel.

    state:  (B, state_size) or (n_agents, B, state_size) float array.
    packed: output of pack_actor_params / pack_multi_actor_params.
    """
    squeeze_agents = state.ndim == 2
    if squeeze_agents:
        state = state[None]
    n_agents, B, S = state.shape
    assert S == packed.sizes[0], "state_size mismatch with packed params"
    assert n_agents == packed.weights[0].shape[0], "n_agents mismatch"

    compute_dtype = packed.compute_dtype
    is_f32 = compute_dtype == jnp.dtype(jnp.float32)
    num_layers = len(packed.weights)
    sizes_p = packed.sizes_p
    A = packed.action_size

    if f32_epilogue is None:
        # f32 ReLU epilogue only needed where there is no bf16 VPU (v5e).
        f32_epilogue = is_f32
    if out_dtype is None:
        out_dtype = compute_dtype      # bf16 output halves store DMA on bf16 path
    out_dtype = jnp.dtype(out_dtype)

    # ---- batch tiling: big tiles amortize per-step overhead, capped so the
    #      (tile, 128k) intermediates don't spill the 64-vreg file.
    b8 = _round_up(B, 8)
    if tile_b is None:
        tile_b = 256 if is_f32 else 512
    tile = max(8, min(_round_up(tile_b, 8), b8))
    b_pad = _round_up(B, tile)
    num_tiles = b_pad // tile
    grid = (n_agents, num_tiles)

    # ---- single-pass pad (+ cast) of the activations; no zeros + DUS.
    x = jnp.pad(state.astype(compute_dtype),
                ((0, 0), (0, b_pad - B), (0, sizes_p[0] - S)))

    # ---- resident parameter footprint (per agent).
    itemsize = jnp.dtype(compute_dtype).itemsize
    resident_bytes = sum(sizes_p[i] * sizes_p[i + 1] * itemsize
                         + sizes_p[i + 1] * 4 for i in range(num_layers))
    # Only drop to single-buffered resident weights when double-buffering them
    # would actually pressure VMEM (large hidden sizes, matters on v7x 64 MiB).
    single_buffer_params = 2 * resident_bytes > (8 << 20)

    def _param_spec(block_shape):
        if single_buffer_params:
            return pl.BlockSpec(block_shape, lambda a, i: (a, 0, 0),
                                pipeline_mode=pl.Buffered(1))
        return pl.BlockSpec(block_shape, lambda a, i: (a, 0, 0))

    # ---- BlockSpecs: batch tile streams over the grid; weights/biases have a
    #      constant (per-agent) block index so they stay resident in VMEM
    #      across batch tiles.  Leading agent dim is squeezed out (None).
    in_specs = [pl.BlockSpec((None, tile, sizes_p[0]), lambda a, i: (a, i, 0))]
    flat_inputs = [x]
    for li in range(num_layers):
        in_specs.append(_param_spec((None, sizes_p[li], sizes_p[li + 1])))
        in_specs.append(_param_spec((None, 1, sizes_p[li + 1])))
        flat_inputs.append(packed.weights[li])
        flat_inputs.append(packed.biases[li])
    # (Biases are kept as separate tiny inputs; folding them into one stacked
    #  array is a minor DMA-bookkeeping win left on the table.)

    out_specs = pl.BlockSpec((None, tile, sizes_p[-1]), lambda a, i: (a, i, 0))
    out_shape = jax.ShapeDtypeStruct((n_agents, b_pad, sizes_p[-1]), out_dtype)

    # ---- megacore semantics: parallel over agents (own weights anyway); over
    #      batch tiles only when there are enough tiles to amortize the
    #      duplicated resident-weight fetch per TensorCore (v7x).
    if n_agents >= 2:
        semantics = ("parallel", "arbitrary")
    elif num_tiles > 2:
        semantics = ("arbitrary", "parallel")
    else:
        semantics = ("arbitrary", "arbitrary")

    # ---- explicit VMEM budget (double-buffered activations + resident params
    #      + f32 intermediates) with headroom, capped to the smallest (v7x) VMEM.
    if vmem_limit_bytes is None:
        act_bytes = 2 * tile * (sizes_p[0] * itemsize
                                + sizes_p[-1] * out_dtype.itemsize)
        inter_bytes = sum(tile * sizes_p[i + 1] * 4 for i in range(num_layers))
        param_bytes = resident_bytes * (1 if single_buffer_params else 2)
        vmem_limit_bytes = min(64 << 20,
                               act_bytes + param_bytes + 2 * inter_bytes
                               + (8 << 20))

    # ---- advisory cost estimate for XLA scheduling around the custom call.
    flops = 2 * n_agents * b_pad * sum(sizes_p[i] * sizes_p[i + 1]
                                       for i in range(num_layers))
    bytes_accessed = int(n_agents * (b_pad * sizes_p[0] * itemsize
                                     + resident_bytes
                                     + b_pad * sizes_p[-1] * out_dtype.itemsize))
    cost = pl.CostEstimate(flops=flops,
                           transcendentals=n_agents * b_pad * sizes_p[-1],
                           bytes_accessed=bytes_accessed)

    kernel = functools.partial(_actor_kernel, num_layers, compute_dtype,
                               f32_epilogue)

    out = pl.pallas_call(
        kernel,
        out_shape=out_shape,
        grid=grid,
        in_specs=in_specs,
        out_specs=out_specs,
        compiler_params=pltpu.CompilerParams(
            dimension_semantics=semantics,
            vmem_limit_bytes=int(vmem_limit_bytes)),
        cost_estimate=cost,
    )(*flat_inputs)

    if slice_output:
        out = out[:, :B, :A]
    if squeeze_agents:
        out = out[0]
    return out


def init_actor_params(key, state_size, action_size, hidden_layers):
    """Deterministic init mirroring Actor.__init__ + reset_parameters().

    Hidden-layer weights: U(-1/sqrt(fan), 1/sqrt(fan)) with fan =
    weight.size()[0] == out_features (reproducing hidden_init's convention).
    Hidden-layer biases: PyTorch default U(-1/sqrt(in), 1/sqrt(in)).
    Output layer weight & bias: U(-3e-3, 3e-3).
    Weights are stored transposed: (in_features, out_features).
    """
    params = []
    sizes = [state_size] + list(hidden_layers)
    for i in range(len(hidden_layers)):
        fan_in_torch = sizes[i + 1]          # hidden_init uses weight.size()[0]
        lim_w = 1.0 / math.sqrt(fan_in_torch)
        lim_b = 1.0 / math.sqrt(sizes[i])    # default torch Linear bias init
        key, kw, kb = jax.random.split(key, 3)
        w = jax.random.uniform(kw, (sizes[i], sizes[i + 1]), jnp.float32,
                               minval=-lim_w, maxval=lim_w)
        b = jax.random.uniform(kb, (1, sizes[i + 1]), jnp.float32,
                               minval=-lim_b, maxval=lim_b)
        params.append((w, b))
    key, kw, kb = jax.random.split(key, 3)
    w_out = jax.random.uniform(kw, (sizes[-1], action_size), jnp.float32,
                               minval=-3e-3, maxval=3e-3)
    b_out = jax.random.uniform(kb, (1, action_size), jnp.float32,
                               minval=-3e-3, maxval=3e-3)
    params.append((w_out, b_out))
    return params


def actor_reference(state, params):
    """Pure-JAX reference for correctness checking."""
    h = state
    for w, b in params[:-1]:
        h = jnp.maximum(h @ w + b, 0.0)
    w_out, b_out = params[-1]
    return jnp.tanh(h @ w_out + b_out)


if __name__ == "__main__":
    key = jax.random.PRNGKey(0)

    batch = 8
    state_size = 32
    action_size = 8
    hidden_layers = [64, 64]
    n_agents = 3

    key, k_state, k_params = jax.random.split(key, 3)
    state = jax.random.normal(k_state, (batch, state_size), jnp.float32)
    params = init_actor_params(k_params, state_size, action_size, hidden_layers)
    ref = actor_reference(state, params)

    # f32 path: exact match with the reference.
    packed_f32 = pack_actor_params(params, compute_dtype=jnp.float32)
    out_f32 = jax.block_until_ready(actor_forward(state, packed_f32))
    assert out_f32.shape == (batch, action_size)
    assert jnp.allclose(out_f32, ref, atol=1e-5, rtol=1e-5), "f32 mismatch"

    # bf16 end-to-end fast path (v6e/v7x): bf16 MXU + bf16 ReLU, f32 accumulate.
    packed_bf16 = pack_actor_params(params, compute_dtype=jnp.bfloat16)
    out_bf16 = jax.block_until_ready(actor_forward(state, packed_bf16))
    assert out_bf16.shape == (batch, action_size)
    assert jnp.allclose(out_bf16.astype(jnp.float32), ref,
                        atol=3e-2, rtol=3e-2), "bf16 mismatch"

    # v5e-style path: bf16 MXU operands with an f32 ReLU epilogue.
    out_v5e = jax.block_until_ready(
        actor_forward(state, packed_bf16, f32_epilogue=True,
                      out_dtype=jnp.float32))
    assert jnp.allclose(out_v5e, ref, atol=3e-2, rtol=3e-2), "v5e-path mismatch"

    # Multi-agent fused call: one pallas_call for all agents (amortizes
    # launch / pipeline prologue across agents — the MADDPG use case).
    key, k_ms = jax.random.split(key)
    agent_keys = jax.random.split(key, n_agents)
    agent_params = [init_actor_params(k, state_size, action_size, hidden_layers)
                    for k in agent_keys]
    packed_multi = pack_multi_actor_params(agent_params,
                                           compute_dtype=jnp.float32)
    multi_state = jax.random.normal(k_ms, (n_agents, batch, state_size),
                                    jnp.float32)
    multi_out = jax.block_until_ready(actor_forward(multi_state, packed_multi))
    assert multi_out.shape == (n_agents, batch, action_size)
    multi_ref = jnp.stack([actor_reference(multi_state[a], agent_params[a])
                           for a in range(n_agents)])
    assert jnp.allclose(multi_out, multi_ref, atol=1e-5, rtol=1e-5), \
        "multi-agent mismatch"

    print("KERNEL_OK")
</pallas_src>

<mosaic_0001>
module attributes {stable_mosaic.version = 11 : i64} {
  func.func @_actor_kernel(%arg0: i32, %arg1: i32, %arg2: memref<1x8x128xf32, #tpu.memory_space<vmem>>, %arg3: memref<1x128x128xf32, #tpu.memory_space<vmem>>, %arg4: memref<1x1x128xf32, #tpu.memory_space<vmem>>, %arg5: memref<1x128x128xf32, #tpu.memory_space<vmem>>, %arg6: memref<1x1x128xf32, #tpu.memory_space<vmem>>, %arg7: memref<1x128x128xf32, #tpu.memory_space<vmem>>, %arg8: memref<1x1x128xf32, #tpu.memory_space<vmem>>, %arg9: memref<1x8x128xf32, #tpu.memory_space<vmem>>) attributes {dimension_semantics = [#tpu.dimension_semantics<arbitrary>, #tpu.dimension_semantics<arbitrary>], iteration_bounds = array<i64: 1, 1>, scalar_prefetch = 0 : i64, scratch_operands = 0 : i64, tpu.core_type = #tpu.core_type<tc>, window_params = [{transform_indices = @transform_0, window_bounds = array<i64: 1, 8, 128>}, {transform_indices = @transform_1, window_bounds = array<i64: 1, 128, 128>}, {transform_indices = @transform_2, window_bounds = array<i64: 1, 1, 128>}, {transform_indices = @transform_3, window_bounds = array<i64: 1, 128, 128>}, {transform_indices = @transform_4, window_bounds = array<i64: 1, 1, 128>}, {transform_indices = @transform_5, window_bounds = array<i64: 1, 128, 128>}, {transform_indices = @transform_6, window_bounds = array<i64: 1, 1, 128>}, {transform_indices = @transform_7, window_bounds = array<i64: 1, 8, 128>}]} {
    %c0 = arith.constant 0 : index
    %c0_0 = arith.constant 0 : index
    %c0_1 = arith.constant 0 : index
    %0 = vector.load %arg2[%c0, %c0_0, %c0_1] : memref<1x8x128xf32, #tpu.memory_space<vmem>>, vector<1x8x128xf32>
    %1 = vector.shape_cast %0 : vector<1x8x128xf32> to vector<8x128xf32>
    %c0_2 = arith.constant 0 : index
    %c0_3 = arith.constant 0 : index
    %c0_4 = arith.constant 0 : index
    %2 = vector.load %arg3[%c0_2, %c0_3, %c0_4] : memref<1x128x128xf32, #tpu.memory_space<vmem>>, vector<1x128x128xf32>
    %3 = vector.shape_cast %2 : vector<1x128x128xf32> to vector<128x128xf32>
    %c0_5 = arith.constant 0 : index
    %c0_6 = arith.constant 0 : index
    %c0_7 = arith.constant 0 : index
    %4 = vector.load %arg4[%c0_5, %c0_6, %c0_7] : memref<1x1x128xf32, #tpu.memory_space<vmem>>, vector<1x1x128xf32>
    %5 = vector.shape_cast %4 : vector<1x1x128xf32> to vector<1x128xf32>
    %cst = arith.constant dense<0.000000e+00> : vector<8x128xf32>
    %6 = tpu.matmul %1, %3, %cst {dimension_numbers = #tpu.dot_dimension_numbers<[1], [0], [0], [1], [0, 0, 1, 1], [], []>} : vector<8x128xf32>, vector<128x128xf32>, vector<8x128xf32> -> vector<8x128xf32>
    %7 = vector.broadcast %5 : vector<1x128xf32> to vector<8x128xf32>
    %8 = arith.addf %6, %7 : vector<8x128xf32>
    %cst_8 = arith.constant 0.000000e+00 : f32
    %9 = vector.broadcast %cst_8 : f32 to vector<8x128xf32>
    %10 = arith.maximumf %8, %9 : vector<8x128xf32>
    %c0_9 = arith.constant 0 : index
    %c0_10 = arith.constant 0 : index
    %c0_11 = arith.constant 0 : index
    %11 = vector.load %arg5[%c0_9, %c0_10, %c0_11] : memref<1x128x128xf32, #tpu.memory_space<vmem>>, vector<1x128x128xf32>
    %12 = vector.shape_cast %11 : vector<1x128x128xf32> to vector<128x128xf32>
    %c0_12 = arith.constant 0 : index
    %c0_13 = arith.constant 0 : index
    %c0_14 = arith.constant 0 : index
    %13 = vector.load %arg6[%c0_12, %c0_13, %c0_14] : memref<1x1x128xf32, #tpu.memory_space<vmem>>, vector<1x1x128xf32>
    %14 = vector.shape_cast %13 : vector<1x1x128xf32> to vector<1x128xf32>
    %cst_15 = arith.constant dense<0.000000e+00> : vector<8x128xf32>
    %15 = tpu.matmul %10, %12, %cst_15 {dimension_numbers = #tpu.dot_dimension_numbers<[1], [0], [0], [1], [0, 0, 1, 1], [], []>} : vector<8x128xf32>, vector<128x128xf32>, vector<8x128xf32> -> vector<8x128xf32>
    %16 = vector.broadcast %14 : vector<1x128xf32> to vector<8x128xf32>
    %17 = arith.addf %15, %16 : vector<8x128xf32>
    %cst_16 = arith.constant 0.000000e+00 : f32
    %18 = vector.broadcast %cst_16 : f32 to vector<8x128xf32>
    %19 = arith.maximumf %17, %18 : vector<8x128xf32>
    %c0_17 = arith.constant 0 : index
    %c0_18 = arith.constant 0 : index
    %c0_19 = arith.constant 0 : index
    %20 = vector.load %arg7[%c0_17, %c0_18, %c0_19] : memref<1x128x128xf32, #tpu.memory_space<vmem>>, vector<1x128x128xf32>
    %21 = vector.shape_cast %20 : vector<1x128x128xf32> to vector<128x128xf32>
    %c0_20 = arith.constant 0 : index
    %c0_21 = arith.constant 0 : index
    %c0_22 = arith.constant 0 : index
    %22 = vector.load %arg8[%c0_20, %c0_21, %c0_22] : memref<1x1x128xf32, #tpu.memory_space<vmem>>, vector<1x1x128xf32>
    %23 = vector.shape_cast %22 : vector<1x1x128xf32> to vector<1x128xf32>
    %cst_23 = arith.constant dense<0.000000e+00> : vector<8x128xf32>
    %24 = tpu.matmul %19, %21, %cst_23 {dimension_numbers = #tpu.dot_dimension_numbers<[1], [0], [0], [1], [0, 0, 1, 1], [], []>} : vector<8x128xf32>, vector<128x128xf32>, vector<8x128xf32> -> vector<8x128xf32>
    %25 = vector.broadcast %23 : vector<1x128xf32> to vector<8x128xf32>
    %26 = arith.addf %24, %25 : vector<8x128xf32>
    %27 = math.tanh %26 : vector<8x128xf32>
    %c0_24 = arith.constant 0 : index
    %c0_25 = arith.constant 0 : index
    %c0_26 = arith.constant 0 : index
    %28 = vector.load %arg9[%c0_24, %c0_25, %c0_26] : memref<1x8x128xf32, #tpu.memory_space<vmem>>, vector<1x8x128xf32>
    %29 = vector.shape_cast %28 : vector<1x8x128xf32> to vector<8x128xf32>
    %30 = vector.shape_cast %27 : vector<8x128xf32> to vector<1x8x128xf32>
    tpu.vector_store %arg9[%c0_24, %c0_25, %c0_26], %30 {strides = array<i32>} : memref<1x8x128xf32, #tpu.memory_space<vmem>>, vector<1x8x128xf32>,
    return
  }
  func.func @transform_0(%arg0: i32, %arg1: i32) -> (i32, i32, i32) {
    %c0_i32 = arith.constant 0 : i32
    %c0_i32_0 = arith.constant 0 : i32
    return %arg0, %arg1, %c0_i32 : i32, i32, i32
  }
  func.func @transform_1(%arg0: i32, %arg1: i32) -> (i32, i32, i32) {
    %c0_i32 = arith.constant 0 : i32
    %c0_i32_0 = arith.constant 0 : i32
    %c0_i32_1 = arith.constant 0 : i32
    return %arg0, %c0_i32, %c0_i32_0 : i32, i32, i32
  }
  func.func @transform_2(%arg0: i32, %arg1: i32) -> (i32, i32, i32) {
    %c0_i32 = arith.constant 0 : i32
    %c0_i32_0 = arith.constant 0 : i32
    %c0_i32_1 = arith.constant 0 : i32
    return %arg0, %c0_i32, %c0_i32_0 : i32, i32, i32
  }
  func.func @transform_3(%arg0: i32, %arg1: i32) -> (i32, i32, i32) {
    %c0_i32 = arith.constant 0 : i32
    %c0_i32_0 = arith.constant 0 : i32
    %c0_i32_1 = arith.constant 0 : i32
    return %arg0, %c0_i32, %c0_i32_0 : i32, i32, i32
  }
  func.func @transform_4(%arg0: i32, %arg1: i32) -> (i32, i32, i32) {
    %c0_i32 = arith.constant 0 : i32
    %c0_i32_0 = arith.constant 0 : i32
    %c0_i32_1 = arith.constant 0 : i32
    return %arg0, %c0_i32, %c0_i32_0 : i32, i32, i32
  }
  func.func @transform_5(%arg0: i32, %arg1: i32) -> (i32, i32, i32) {
    %c0_i32 = arith.constant 0 : i32
    %c0_i32_0 = arith.constant 0 : i32
    %c0_i32_1 = arith.constant 0 : i32
    return %arg0, %c0_i32, %c0_i32_0 : i32, i32, i32
  }
  func.func @transform_6(%arg0: i32, %arg1: i32) -> (i32, i32, i32) {
    %c0_i32 = arith.constant 0 : i32
    %c0_i32_0 = arith.constant 0 : i32
    %c0_i32_1 = arith.constant 0 : i32
    return %arg0, %c0_i32, %c0_i32_0 : i32, i32, i32
  }
  func.func @transform_7(%arg0: i32, %arg1: i32) -> (i32, i32, i32) {
    %c0_i32 = arith.constant 0 : i32
    %c0_i32_0 = arith.constant 0 : i32
    return %arg0, %arg1, %c0_i32 : i32, i32, i32
  }
}

</mosaic_0001>

<bundles_post_ra>
// kernel: tpu_custom_call.1
= control target key start
LH: loop header
LB: loop body
LE: loop exit
PB: predicated region body
PF: predicated region fallthrough
CT: control target
= control target key end

     0   :  { %12 = vsyncpa [#allocation3], 0  ;;  %s900_s0 = inlined_call_operand.hbm [shape: f32[1,8,128], index: 0, kind: input, shape index: {}]   ;;  %s901_s1 = inlined_call_operand.hbm [shape: f32[1,128,128], index: 1, kind: input, shape index: {}]   ;;  %s902_s2 = inlined_call_operand.vmem [shape: f32[1,1,128], index: 2, kind: input, shape index: {}]   ;;  %s903_s3 = inlined_call_operand.hbm [shape: f32[1,128,128], index: 3, kind: input, shape index: {}]   ;;  %s904_s4 = inlined_call_operand.vmem [shape: f32[1,1,128], index: 4, kind: input, shape index: {}]   ;;  %s905_s5 = inlined_call_operand.hbm [shape: f32[1,128,128], index: 5, kind: input, shape index: {}]   ;;  %s906_s6 = inlined_call_operand.vmem [shape: f32[1,1,128], index: 6, kind: input, shape index: {}]   ;;  %s907_s7 = inlined_call_operand.hbm [shape: f32[1,8,128], index: 7, kind: output, shape index: {}]  }
   0x1   :  { %13 = vsyncpa [#allocation6], 0 }
   0x2   :  { %14 = vsyncpa [#allocation9], 0 }
   0x3   :  { %15 = vsyncpa [#allocation4], 0  ;;  %s742_s24 = smov [#allocation5]   ;;  %s624_s28 = scalar_lea.hbm %s901_s1, 2048 }
   0x4   :  { %s31_s25 = sshll.u32 %s742_s24, 4  ;;  %p625_p0 = scmp.ne.s32.totalorder %s901_s1, %s624_s28  ;;  %s32_s25 = int_to_ptr.vmem [resolvable:$true] %s31_s25 }
   0x5   :  { %p628_p1 = scmp.lt.u32.totalorder %s624_s28, %s901_s1 }
   0x7   :  { %p630_p2 = pnand %p628_p1, %p625_p0 }
   0x9   :  { %633 = shalt.err (!%p630_p2)
}
   0xa   :  { %s634_s10 = scalar_lea.vmem %s32_s25, 2048  ;;  %p639_p4 = scmp.lt.s32.totalorder %s32_s25, %s32_s25 }
   0xb   :  { %p635_p3 = scmp.ne.s32.totalorder %s32_s25, %s634_s10  ;;  %p640_p5 = scmp.lt.s32.totalorder %s634_s10, %s634_s10 }
   0xd   :  { %p641_p6 = por %p640_p5, %p639_p4 }
   0xf   :  { %p642_p7 = pnand %p641_p6, %p635_p3 }
  0x11   :  { %645 = shalt.err (!%p642_p7)
}
  0x12   :  { %s743_s11 = smov 128   ;;  %s744_s12 = smov 8  }
  0x13   :  { %37 = dma.hbm_to_vmem [thread:$0]  %s901_s1, 2048, %s32_s25, [#allocation6], %s743_s11, %s743_s11, %s744_s12  }
  0x14   :  { %s745_s15 = smov [#allocation2]   ;;  %s746_s17 = smov [#allocation7]  }
  0x15   :  { %s22_s16 = sshll.u32 %s745_s15, 4  ;;  %s45_s18 = sshll.u32 %s746_s17, 4  ;;  %s23_s16 = int_to_ptr.vmem [resolvable:$true] %s22_s16  ;;  %s46_s18 = int_to_ptr.vmem [resolvable:$true] %s45_s18 }
  0x16   :  { %s646_s21 = scalar_lea.hbm %s900_s0, 128 }
  0x17   :  { %p647_p8 = scmp.ne.s32.totalorder %s900_s0, %s646_s21  ;;  %p650_p9 = scmp.lt.u32.totalorder %s646_s21, %s900_s0 }
  0x19   :  { %p652_p10 = pnand %p650_p9, %p647_p8 }
  0x1b   :  { %655 = shalt.err (!%p652_p10)
}
  0x1c   :  { %s656_s1 = scalar_lea.vmem %s23_s16, 128  ;;  %p661_p12 = scmp.lt.s32.totalorder %s23_s16, %s23_s16 }
  0x1d   :  { %p657_p11 = scmp.ne.s32.totalorder %s23_s16, %s656_s1  ;;  %p662_p13 = scmp.lt.s32.totalorder %s656_s1, %s656_s1 }
  0x1f   :  { %p663_p0 = por %p662_p13, %p661_p12 }
  0x21   :  { %p664_p1 = pnand %p663_p0, %p657_p11 }
  0x23   :  { %667 = shalt.err (!%p664_p1)
}
  0x24   :  { %25 = dma.hbm_to_vmem [thread:$0]  %s900_s0, 128, %s23_s16, [#allocation3]  }
  0x25   :  { %s668_s30 = scalar_lea.hbm %s903_s3, 2048 }
  0x26   :  { %p669_p2 = scmp.ne.s32.totalorder %s903_s3, %s668_s30  ;;  %p672_p3 = scmp.lt.u32.totalorder %s668_s30, %s903_s3 }
  0x28   :  { %p674_p4 = pnand %p672_p3, %p669_p2 }
  0x2a   :  { %677 = shalt.err (!%p674_p4)
}
  0x2b   :  { %s678_s14 = scalar_lea.vmem %s46_s18, 2048  ;;  %p683_p6 = scmp.lt.s32.totalorder %s46_s18, %s46_s18 }
  0x2c   :  { %p679_p5 = scmp.ne.s32.totalorder %s46_s18, %s678_s14  ;;  %p684_p7 = scmp.lt.s32.totalorder %s678_s14, %s678_s14 }
  0x2e   :  { %p685_p8 = por %p684_p7, %p683_p6 }
  0x30   :  { %p686_p9 = pnand %p685_p8, %p679_p5 }
  0x32   :  { %689 = shalt.err (!%p686_p9)
}
  0x33   :  { %51 = dma.hbm_to_vmem [thread:$0]  %s903_s3, 2048, %s46_s18, [#allocation6], %s743_s11, %s743_s11, %s744_s12  }
  0x34   :  { %s747_s16 = smov [#allocation8]   ;;  %s690_s21 = scalar_lea.hbm %s905_s5, 2048 }
  0x35   :  { %s59_s17 = sshll.u32 %s747_s16, 4  ;;  %p691_p10 = scmp.ne.s32.totalorder %s905_s5, %s690_s21  ;;  %s60_s17 = int_to_ptr.vmem [resolvable:$true] %s59_s17 }
  0x36   :  { %p694_p11 = scmp.lt.u32.totalorder %s690_s21, %s905_s5 }
  0x38   :  { %p696_p12 = pnand %p694_p11, %p691_p10 }
  0x3a   :  { %699 = shalt.err (!%p696_p12)
}
  0x3b   :  { %s700_s1 = scalar_lea.vmem %s60_s17, 2048  ;;  %p705_p0 = scmp.lt.s32.totalorder %s60_s17, %s60_s17 }
  0x3c   :  { %p701_p13 = scmp.ne.s32.totalorder %s60_s17, %s700_s1  ;;  %p706_p1 = scmp.lt.s32.totalorder %s700_s1, %s700_s1 }
  0x3e   :  { %p707_p2 = por %p706_p1, %p705_p0 }
  0x40   :  { %p708_p3 = pnand %p707_p2, %p701_p13 }
  0x42   :  { %711 = shalt.err (!%p708_p3)
}
  0x43   :  { %65 = dma.hbm_to_vmem [thread:$0]  %s905_s5, 2048, %s60_s17, [#allocation9], %s743_s11, %s743_s11, %s744_s12  }
  0x44   :  { %734 = dma.done.wait [#allocation3], 128  }
  0x45   :  { %735 = vsyncadd [#allocation3], 4294967168 }
  0x46   :  { %736 = dma.done.wait [#allocation6], 4096  }
  0x47   :  { %737 = vsyncadd [#allocation6], 4294963200 }
  0x48   :  { %738 = dma.done.wait [#allocation9], 2048  }
  0x49   :  { %739 = vsyncadd [#allocation9], 4294965248  ;;  %v748_v0 = vmov 0.0|0.0   ;;  %vm749_vm0 = vmmov 0   ;;  %v750_v1 = vmov 0.0   ;;  %v81_v2 = vld [vmem:[#allocation5] sm:$0xff] }
  0x4a   :  { %540 = vmatprep.subr.bf16.mxu0 %v748_v0  ;;  %467 = vmatprep.mubr.msk.f32.mxu0 %vm749_vm0, %v750_v1  ;;  %v82_v3 = vld [vmem:[#allocation5 + $0x8] sm:$0xff]  ;;  %v83_v4 = vld [vmem:[#allocation5 + $0x10] sm:$0xff]  ;;  %v84_v6 = vld [vmem:[#allocation5 + $0x18] sm:$0xff]  ;;  %s751_s28 = smov [#allocation10]  }
  0x4b   :  { %564 = vmatprep.subr.bf16.mxu1 %v748_v0  ;;  %502 = vmatprep.mubr.msk.f32.mxu1 %vm749_vm0, %v750_v1  ;;  %v541_v5 = vpack.c.bf16 %v82_v3, %v81_v2  ;;  %v544_v7 = vpack.c.bf16 %v84_v6, %v83_v4  ;;  %v85_v8 = vld [vmem:[#allocation5 + $0x20] sm:$0xff]  ;;  %v86_v9 = vld [vmem:[#allocation5 + $0x28] sm:$0xff]  ;;  %v177_v12 = vld [vmem:[#allocation7 + $0x10] sm:$0xff]  ;;  %s370_s29 = sshll.u32 %s751_s28, 4  ;;  %s371_s29 = int_to_ptr.vmem [resolvable:$true] %s370_s29 }
  0x4c   :  { %v175_v10 = vld [vmem:[#allocation7] sm:$0xff]  ;;  %v176_v11 = vld [vmem:[#allocation7 + $0x8] sm:$0xff]  ;;  %v178_v13 = vld [vmem:[#allocation7 + $0x18] sm:$0xff]  ;;  %v547_v14 = vpack.c.bf16 %v86_v9, %v85_v8  ;;  %s712_s30 = scalar_lea.vmem %s371_s29, 128  ;;  %p717_p5 = scmp.lt.s32.totalorder %s371_s29, %s371_s29 }
  0x4d   :  { %542 = vmatpush3.bf16.msra.mxu0 %v541_v5  ;;  %v565_v15 = vpack.c.bf16 %v176_v11, %v175_v10  ;;  %v87_v16 = vld [vmem:[#allocation5 + $0x30] sm:$0xff]  ;;  %v88_v17 = vld [vmem:[#allocation5 + $0x38] sm:$0xff]  ;;  %v568_v18 = vpack.c.bf16 %v178_v13, %v177_v12  ;;  %v179_v19 = vld [vmem:[#allocation7 + $0x20] sm:$0xff]  ;;  %p713_p4 = scmp.ne.s32.totalorder %s371_s29, %s712_s30  ;;  %p718_p6 = scmp.lt.s32.totalorder %s712_s30, %s712_s30 }
  0x4e   :  { %543 = vmatprep.subr.bf16.mxu0 %v748_v0  ;;  %v180_v20 = vld [vmem:[#allocation7 + $0x28] sm:$0xff]  ;;  %v550_v21 = vpack.c.bf16 %v88_v17, %v87_v16  ;;  %v89_v22 = vld [vmem:[#allocation5 + $0x40] sm:$0xff]  ;;  %v181_v25 = vld [vmem:[#allocation7 + $0x30] sm:$0xff] }
  0x4f   :  { %566 = vmatpush3.bf16.msra.mxu1 %v565_v15  ;;  %v90_v23 = vld [vmem:[#allocation5 + $0x48] sm:$0xff]  ;;  %v571_v24 = vpack.c.bf16 %v180_v20, %v179_v19  ;;  %v182_v26 = vld [vmem:[#allocation7 + $0x38] sm:$0xff]  ;;  %v91_v28 = vld [vmem:[#allocation5 + $0x50] sm:$0xff]  ;;  %p719_p7 = por %p718_p6, %p717_p5 }
  0x50   :  { %567 = vmatprep.subr.bf16.mxu1 %v748_v0  ;;  %v553_v27 = vpack.c.bf16 %v90_v23, %v89_v22  ;;  %v92_v29 = vld [vmem:[#allocation5 + $0x58] sm:$0xff]  ;;  %v574_v30 = vpack.c.bf16 %v182_v26, %v181_v25  ;;  %v183_v31 = vld [vmem:[#allocation7 + $0x40] sm:$0xff]  ;;  %v184_v32 = vld [vmem:[#allocation7 + $0x48] sm:$0xff] }
  0x51   :  { %545 = vmatpush3.bf16.msra.mxu0 %v544_v7  ;;  %v556_v33 = vpack.c.bf16 %v92_v29, %v91_v28  ;;  %v93_v34 = vld [vmem:[#allocation5 + $0x60] sm:$0xff]  ;;  %v94_v35 = vld [vmem:[#allocation5 + $0x68] sm:$0xff]  ;;  %v577_v36 = vpack.c.bf16 %v184_v32, %v183_v31  ;;  %v185_v37 = vld [vmem:[#allocation7 + $0x50] sm:$0xff]  ;;  %p720_p8 = pnand %p719_p7, %p713_p4 }
  0x52   :  { %546 = vmatprep.subr.bf16.mxu0 %v748_v0  ;;  %v186_v38 = vld [vmem:[#allocation7 + $0x58] sm:$0xff]  ;;  %v559_v39 = vpack.c.bf16 %v94_v35, %v93_v34  ;;  %v95_v40 = vld [vmem:[#allocation5 + $0x70] sm:$0xff]  ;;  %v187_v43 = vld [vmem:[#allocation7 + $0x60] sm:$0xff] }
  0x53   :  { %569 = vmatpush3.bf16.msra.mxu1 %v568_v18  ;;  %v96_v41 = vld [vmem:[#allocation5 + $0x78] sm:$0xff]  ;;  %v580_v42 = vpack.c.bf16 %v186_v38, %v185_v37  ;;  %v188_v44 = vld [vmem:[#allocation7 + $0x68] sm:$0xff]  ;;  %v189_v48 = vld [vmem:[#allocation7 + $0x70] sm:$0xff] }
  0x54   :  { %570 = vmatprep.subr.bf16.mxu1 %v748_v0  ;;  %v562_v45 = vpack.c.bf16 %v96_v41, %v95_v40  ;;  %v583_v46 = vpack.c.bf16 %v188_v44, %v187_v43  ;;  %v80_v47 = vld [vmem:[#allocation2] sm:$0xff]  ;;  %v269_v51 = vld [vmem:[#allocation8] sm:$0xff]  ;;  %v270_v52 = vld [vmem:[#allocation8 + $0x8] sm:$0xff] }
  0x55   :  { %548 = vmatpush3.bf16.msra.mxu0 %v547_v14  ;;  %v190_v49 = vld [vmem:[#allocation7 + $0x78] sm:$0xff]  ;;  %v271_v53 = vld [vmem:[#allocation8 + $0x10] sm:$0xff]  ;;  %v589_v54 = vpack.c.bf16 %v270_v52, %v269_v51  ;;  %v273_v57 = vld [vmem:[#allocation8 + $0x20] sm:$0xff] }
  0x56   :  { %549 = vmatprep.subr.bf16.mxu0 %v748_v0  ;;  %v586_v50 = vpack.c.bf16 %v190_v49, %v189_v48  ;;  %v272_v55 = vld [vmem:[#allocation8 + $0x18] sm:$0xff]  ;;  %v274_v58 = vld [vmem:[#allocation8 + $0x28] sm:$0xff]  ;;  %v275_v60 = vld [vmem:[#allocation8 + $0x30] sm:$0xff] }
  0x57   :  { %572 = vmatpush3.bf16.msra.mxu1 %v571_v24  ;;  %v592_v56 = vpack.c.bf16 %v272_v55, %v271_v53  ;;  %v595_v59 = vpack.c.bf16 %v274_v58, %v273_v57  ;;  %v276_v61 = vld [vmem:[#allocation8 + $0x38] sm:$0xff]  ;;  %v277_v63 = vld [vmem:[#allocation8 + $0x40] sm:$0xff]  ;;  %v279_v3 = vld [vmem:[#allocation8 + $0x50] sm:$0xff] }
  0x58   :  { %573 = vmatprep.subr.bf16.mxu1 %v748_v0  ;;  %v598_v62 = vpack.c.bf16 %v276_v61, %v275_v60  ;;  %v280_v4 = vld [vmem:[#allocation8 + $0x58] sm:$0xff]  ;;  %v281_v6 = vld [vmem:[#allocation8 + $0x60] sm:$0xff]  ;;  %v282_v7 = vld [vmem:[#allocation8 + $0x68] sm:$0xff] }
  0x59   :  { %551 = vmatpush3.bf16.msra.mxu0 %v550_v21  ;;  %v604_v5 = vpack.c.bf16 %v280_v4, %v279_v3  ;;  %v607_v8 = vpack.c.bf16 %v282_v7, %v281_v6  ;;  %v381_v9 = vld [vmem:[%s902_s2] ss:$0 sm:$0xff]  ;;  %v283_v14 = vld [vmem:[#allocation8 + $0x70] sm:$0xff] }
  0x5a   :  { %552 = vmatprep.subr.bf16.mxu0 %v748_v0  ;;  %v284_v15 = vld [vmem:[#allocation8 + $0x78] sm:$0xff] }
  0x5b   :  { %575 = vmatpush3.bf16.msra.mxu1 %v574_v30  ;;  %v610_v16 = vpack.c.bf16 %v284_v15, %v283_v14  ;;  %v382_v17 = vld [vmem:[%s904_s4] ss:$0 sm:$0xff] }
  0x5c   :  { %576 = vmatprep.subr.bf16.mxu1 %v748_v0  ;;  %v383_v21 = vld [vmem:[%s906_s6] ss:$0 sm:$0xff] }
  0x5d   :  { %554 = vmatpush3.bf16.msra.mxu0 %v553_v27 }
  0x5e   :  { %555 = vmatprep.subr.bf16.mxu0 %v748_v0 }
  0x5f   :  { %578 = vmatpush3.bf16.msra.mxu1 %v577_v36 }
  0x60   :  { %579 = vmatprep.subr.bf16.mxu1 %v748_v0 }
  0x61   :  { %557 = vmatpush3.bf16.msra.mxu0 %v556_v33 }
  0x62   :  { %558 = vmatprep.subr.bf16.mxu0 %v748_v0 }
  0x63   :  { %581 = vmatpush3.bf16.msra.mxu1 %v580_v42 }
  0x64   :  { %582 = vmatprep.subr.bf16.mxu1 %v748_v0 }
  0x65   :  { %560 = vmatpush3.bf16.msra.mxu0 %v559_v39 }
  0x66   :  { %561 = vmatprep.subr.bf16.mxu0 %v748_v0 }
  0x67   :  { %584 = vmatpush3.bf16.msra.mxu1 %v583_v46 }
  0x68   :  { %585 = vmatprep.subr.bf16.mxu1 %v748_v0 }
  0x69   :  { %563 = vmatpush3.bf16.msra.mxu0 %v562_v45 }
  0x6a   :  { %588 = vmatprep.subr.bf16.mxu0 %v748_v0 }
  0x6b   :  { %587 = vmatpush3.bf16.msra.mxu1 %v586_v50 }
  0x6c   :  { %468 = vmatmul.mubr.f32.vlgmr.msra.gmra.mrb[0].mxu0 %v80_v47 }
  0x6d   :  { %537 = vmatprep.mubr.msk.f32.mxu0 %vm749_vm0, %v750_v1  ;;  %590 = vmatpush3.bf16.msra.mxu0 %v589_v54  ;;  %v278_v1 = vld [vmem:[#allocation8 + $0x48] sm:$0xff] }
  0x6e   :  { %591 = vmatprep.subr.bf16.mxu0 %v748_v0  ;;  %v601_v2 = vpack.c.bf16 %v278_v1, %v277_v63 }
  0x71   :  { %593 = vmatpush3.bf16.msra.mxu0 %v592_v56 }
  0x72   :  { %594 = vmatprep.subr.bf16.mxu0 %v748_v0 }
  0x75   :  { %596 = vmatpush3.bf16.msra.mxu0 %v595_v59 }
  0x76   :  { %597 = vmatprep.subr.bf16.mxu0 %v748_v0 }
  0x79   :  { %599 = vmatpush3.bf16.msra.mxu0 %v598_v62 }
  0x7a   :  { %600 = vmatprep.subr.bf16.mxu0 %v748_v0 }
  0x7d   :  { %602 = vmatpush3.bf16.msra.mxu0 %v601_v2 }
  0x7e   :  { %603 = vmatprep.subr.bf16.mxu0 %v748_v0 }
  0x81   :  { %605 = vmatpush3.bf16.msra.mxu0 %v604_v5 }
  0x82   :  { %606 = vmatprep.subr.bf16.mxu0 %v748_v0 }
  0x85   :  { %608 = vmatpush3.bf16.msra.mxu0 %v607_v8 }
  0x86   :  { %609 = vmatprep.subr.bf16.mxu0 %v748_v0 }
  0x89   :  { %611 = vmatpush3.bf16.msra.mxu0 %v610_v16 }
 0x13f   :  { %v170_v10 = vpop.f32.mrb[0].mxu0 }
 0x140   :  { %v171_v11 = vadd.f32 %v381_v9, %v170_v10  ;;  %v469_v12 = vpop.f32.mrb[1].mxu0 }
 0x142   :  { %v174_v13 = vmax.f32 %v171_v11, 0.0 }
 0x144   :  { %503 = vmatmul.mubr.f32.vlgmr.msra.gmra.mrb[0].mxu1 %v174_v13 }
 0x217   :  { %v264_v18 = vpop.f32.mrb[0].mxu1 }
 0x218   :  { %v265_v19 = vadd.f32 %v382_v17, %v264_v18  ;;  %v504_v0 = vpop.f32.mrb[1].mxu1 }
 0x21a   :  { %v268_v20 = vmax.f32 %v265_v19, 0.0 }
 0x21c   :  { %538 = vmatmul.mubr.f32.vlgmr.msra.gmra.mrb[2].mxu0 %v268_v20 }
 0x2ef   :  { %v358_v22 = vpop.f32.mrb[2].mxu0 }
 0x2f0   :  { %v359_v23 = vadd.f32 %v383_v21, %v358_v22  ;;  %v539_v24 = vpop.f32.mrb[3].mxu0 }
 0x2f2   :  { %622 = vtanh.f32 %v359_v23 }
 0x2fc   :  { %v623_v25 = vpop.eup %622 }
 0x2fd   :  { %363 = vst [vmem:[#allocation10] sm:$0xff] %v623_v25 }
 0x2fe   :  { %723 = shalt.err (!%p720_p8)
}
 0x2ff   :  { %s724_s6 = scalar_lea.hbm %s907_s7, 128 }
 0x300   :  { %p725_p9 = scmp.ne.s32.totalorder %s907_s7, %s724_s6  ;;  %p728_p10 = scmp.lt.u32.totalorder %s724_s6, %s907_s7 }
 0x302   :  { %p730_p11 = pnand %p728_p10, %p725_p9 }
 0x304   :  { %733 = shalt.err (!%p730_p11)
}
 0x305   :  { %373 = dma.vmem_to_hbm [thread:$0]  %s371_s29, 128, %s907_s7, [#allocation4]  }
 0x306   :  { %740 = dma.done.wait [#allocation4], 128  }
 0x307   :  { %741 = vsyncadd [#allocation4], 4294967168 }
 0x308   :  { %377 = vsyncpa [#allocation3], 1 }
 0x309   :  { %378 = vsyncpa [#allocation6], 1 }
 0x30a   :  { %379 = vsyncpa [#allocation9], 1 }
 0x30b   :  { %380 = vsyncpa [#allocation4], 1 }

</bundles_post_ra>
